<compile_context>
chip_gen: v5e
topology: v5e:2x2
jax: 0.10.0
libtpu: 0.0.40
codegen_flags: <defaults>
</compile_context>

<pallas_src>
import math

import jax
import jax.numpy as jnp
import numpy as np
from jax.experimental import pallas as pl
from jax.experimental.pallas import tpu as pltpu

HID_PAD = 128   # hidden width padded to a full lane group
OUT_PAD = 128   # lane-dense output slab width (result lives in column 0)


def _round_up(x, m):
    return ((x + m - 1) // m) * m


# ---------------------------------------------------------------------------
# Kernels
# ---------------------------------------------------------------------------
def project_kernel(x_ref, w_ref, out_ref):
    """out = x @ W  -- fused [Wl | Wr] projection for layer 1 (f32 accumulate)."""
    out_ref[...] = jnp.dot(
        x_ref[...], w_ref[...], preferred_element_type=jnp.float32
    ).astype(out_ref.dtype)


def sage_agg_kernel(a_ref, pl_ref, pr_ref, dinv_ref, b_in_ref,
                    w_out_ref, b_out_ref, out_ref, acc_ref):
    """One SAGE layer's aggregation + epilogue, gridded as (dst tiles, K tiles).

        acc   += A[i, k] @ Pl[k]                         (MXU, f32 accumulator)
        h      = relu(deg_inv[i] * acc + Pr[i] + b_in)   (finalize, once per tile)
        out[i] = h @ W_out + b_out    (= next layer's fused projection, or the
                                       lane-padded final hid->1 linear)
    """
    k = pl.program_id(1)

    @pl.when(k == 0)
    def _init():
        acc_ref[...] = jnp.zeros_like(acc_ref)

    acc_ref[...] += jnp.dot(
        a_ref[...], pl_ref[...], preferred_element_type=jnp.float32)

    @pl.when(k == pl.num_programs(1) - 1)
    def _finalize():
        h = (acc_ref[...] * dinv_ref[...]
             + pr_ref[...].astype(jnp.float32)
             + b_in_ref[...])
        h = jnp.maximum(h, 0.0)
        out = jnp.dot(h, w_out_ref[...], preferred_element_type=jnp.float32)
        out_ref[...] = (out + b_out_ref[...]).astype(out_ref.dtype)


# ---------------------------------------------------------------------------
# pallas_call wrappers
# ---------------------------------------------------------------------------
def _project(x, w, out_dtype, tm):
    n_pad, in_dim = x.shape
    out_w = w.shape[1]
    return pl.pallas_call(
        project_kernel,
        out_shape=jax.ShapeDtypeStruct((n_pad, out_w), out_dtype),
        grid=(n_pad // tm,),
        in_specs=[
            pl.BlockSpec((tm, in_dim), lambda i: (i, 0)),
            pl.BlockSpec(w.shape, lambda i: (0, 0)),          # resident weights
        ],
        out_specs=pl.BlockSpec((tm, out_w), lambda i: (i, 0)),
        compiler_params=pltpu.CompilerParams(
            dimension_semantics=("parallel",),
            vmem_limit_bytes=32 * 1024 * 1024),
    )(x, w)


def _sage_layer(a, p, deg_inv, b_in, w_out, b_out, out_dtype, tm, tk):
    n_pad = a.shape[0]
    out_w = w_out.shape[1]
    return pl.pallas_call(
        sage_agg_kernel,
        out_shape=jax.ShapeDtypeStruct((n_pad, out_w), out_dtype),
        grid=(n_pad // tm, n_pad // tk),
        in_specs=[
            pl.BlockSpec((tm, tk), lambda i, k: (i, k)),        # A strip (streamed)
            pl.BlockSpec((tk, HID_PAD), lambda i, k: (k, 0)),   # Pl: source-node tile
            pl.BlockSpec((tm, HID_PAD), lambda i, k: (i, 1)),   # Pr: dst-node tile
            pl.BlockSpec((tm, 1), lambda i, k: (i, 0)),         # 1/deg (dst rows)
            pl.BlockSpec((1, HID_PAD), lambda i, k: (0, 0)),    # layer bias
            pl.BlockSpec(w_out.shape, lambda i, k: (0, 0)),     # epilogue weight
            pl.BlockSpec((1, out_w), lambda i, k: (0, 0)),      # epilogue bias
        ],
        out_specs=pl.BlockSpec((tm, out_w), lambda i, k: (i, 0)),
        scratch_shapes=[pltpu.VMEM((tm, HID_PAD), jnp.float32)],
        compiler_params=pltpu.CompilerParams(
            dimension_semantics=("parallel", "arbitrary"),
            vmem_limit_bytes=32 * 1024 * 1024),
    )(a, p, p, deg_inv, b_in, w_out, b_out)   # p passed twice: Pl / Pr views


# ---------------------------------------------------------------------------
# Parameters
# ---------------------------------------------------------------------------
def init_params(key, in_dim, hid_dim=32):
    ks = jax.random.split(key, 8)
    s_in = 1.0 / np.sqrt(in_dim)
    s_hid = 1.0 / np.sqrt(hid_dim)
    u = jax.random.uniform
    return dict(
        # layer 1: lin_l (with bias), lin_r (no bias) -- stored as (in, out)
        wl1=u(ks[0], (in_dim, hid_dim), jnp.float32, -s_in, s_in),
        bl1=u(ks[1], (1, hid_dim), jnp.float32, -s_in, s_in),
        wr1=u(ks[2], (in_dim, hid_dim), jnp.float32, -s_in, s_in),
        # layer 2
        wl2=u(ks[3], (hid_dim, hid_dim), jnp.float32, -s_hid, s_hid),
        bl2=u(ks[4], (1, hid_dim), jnp.float32, -s_hid, s_hid),
        wr2=u(ks[5], (hid_dim, hid_dim), jnp.float32, -s_hid, s_hid),
        # output linear
        wlin=u(ks[6], (hid_dim, 1), jnp.float32, -s_hid, s_hid),
        blin=u(ks[7], (1, 1), jnp.float32, -s_hid, s_hid),
    )


def fuse_and_pad_params(params, in_dim, hid_dim):
    """Concatenate [Wl | Wr] along the output axis and zero-pad to 128 lanes."""
    assert hid_dim <= HID_PAD
    hp = HID_PAD
    wcat1 = jnp.zeros((in_dim, 2 * hp), jnp.float32)
    wcat1 = wcat1.at[:, :hid_dim].set(params["wl1"])
    wcat1 = wcat1.at[:, hp:hp + hid_dim].set(params["wr1"])
    b1 = jnp.zeros((1, hp), jnp.float32).at[:, :hid_dim].set(params["bl1"])

    wcat2 = jnp.zeros((hp, 2 * hp), jnp.float32)
    wcat2 = wcat2.at[:hid_dim, :hid_dim].set(params["wl2"])
    wcat2 = wcat2.at[:hid_dim, hp:hp + hid_dim].set(params["wr2"])
    b2 = jnp.zeros((1, hp), jnp.float32).at[:, :hid_dim].set(params["bl2"])

    wlin = jnp.zeros((hp, OUT_PAD), jnp.float32).at[:hid_dim, :1].set(params["wlin"])
    blin = jnp.zeros((1, OUT_PAD), jnp.float32).at[:, :1].set(params["blin"])
    b_zero = jnp.zeros((1, 2 * hp), jnp.float32)
    return dict(wcat1=wcat1, b1=b1, wcat2=wcat2, b2=b2,
                wlin=wlin, blin=blin, b_zero=b_zero)


# ---------------------------------------------------------------------------
# Graph preprocessing (host/XLA side)
# ---------------------------------------------------------------------------
def build_adjacency(edge_index, n_pad, agg_dtype):
    """Raw 0/1 (count) adjacency A[dst, src] in agg_dtype (exact in bf16) plus
    the f32 per-destination 1/in_degree scale applied inside the kernel."""
    src, dst = edge_index[0], edge_index[1]
    counts = jnp.zeros((n_pad, n_pad), jnp.float32).at[dst, src].add(1.0)
    deg = jnp.sum(counts, axis=1, keepdims=True)
    deg_inv = 1.0 / jnp.maximum(deg, 1.0)   # zero-in-degree rows aggregate to 0
    return counts.astype(agg_dtype), deg_inv


# ---------------------------------------------------------------------------
# Forward pass
# ---------------------------------------------------------------------------
def gnn_forward(x, edge_index, params, *, hid_dim=32,
                agg_dtype=jnp.bfloat16, tile_m=256, tile_k=512):
    n, in_dim = x.shape
    assert tile_m % 128 == 0 and tile_k % 128 == 0
    tm = min(tile_m, _round_up(n, 128))
    tk = min(tile_k, _round_up(n, 128))
    n_pad = _round_up(n, math.lcm(tm, tk))

    x_pad = jnp.zeros((n_pad, in_dim), jnp.float32).at[:n].set(x)
    a, deg_inv = build_adjacency(edge_index, n_pad, agg_dtype)
    fp = fuse_and_pad_params(params, in_dim, hid_dim)

    # Layer 1: fused lin_l/lin_r projection, then aggregation whose epilogue
    # already emits layer 2's fused projection P2 = relu(h1) @ [Wl2 | Wr2].
    p1 = _project(x_pad, fp["wcat1"], agg_dtype, tm)
    p2 = _sage_layer(a, p1, deg_inv, fp["b1"], fp["wcat2"], fp["b_zero"],
                     agg_dtype, tm, tk)
    # Layer 2 aggregation; epilogue applies the final hid->1 linear into a
    # lane-dense (n_pad, 128) slab (column 0 holds the result).
    out_slab = _sage_layer(a, p2, deg_inv, fp["b2"], fp["wlin"], fp["blin"],
                           jnp.float32, tm, tk)
    return out_slab[:n, 0]   # .squeeze()


def gnn_reference(x, edge_index, params):
    """Pure-JAX f32 reference (PyTorch-equivalent semantics)."""
    n = x.shape[0]
    src, dst = edge_index[0], edge_index[1]
    adj = jnp.zeros((n, n), jnp.float32).at[dst, src].add(1.0)
    deg = jnp.maximum(jnp.sum(adj, axis=1, keepdims=True), 1.0)
    a = adj / deg
    h1 = jax.nn.relu(a @ (x @ params["wl1"]) + params["bl1"] + x @ params["wr1"])
    h2 = jax.nn.relu(a @ (h1 @ params["wl2"]) + params["bl2"] + h1 @ params["wr2"])
    return (h2 @ params["wlin"] + params["blin"])[:, 0]


if __name__ == "__main__":
    key = jax.random.PRNGKey(0)
    k_x, k_p = jax.random.split(key)

    N, IN_DIM, HID = 200, 64, 32   # small but exercises padding + a 2x2 grid
    x = jax.random.normal(k_x, (N, IN_DIM), jnp.float32)

    # Deterministic synthetic edge_index (2, E): ring + two skip patterns.
    src = np.concatenate([np.arange(N), np.arange(N), np.arange(N)])
    dst = np.concatenate([(np.arange(N) + 1) % N,
                          (np.arange(N) + 7) % N,
                          (np.arange(N) + 31) % N])
    edge_index = jnp.asarray(np.stack([src, dst]), dtype=jnp.int32)

    params = init_params(k_p, IN_DIM, HID)
    ref = jax.block_until_ready(gnn_reference(x, edge_index, params))

    # 1) f32 path: bit-faithful to the PyTorch module (tight tolerance).
    out_f32 = jax.block_until_ready(
        gnn_forward(x, edge_index, params, hid_dim=HID,
                    agg_dtype=jnp.float32, tile_m=128, tile_k=128))
    assert out_f32.shape == (N,)
    np.testing.assert_allclose(np.asarray(out_f32), np.asarray(ref),
                               rtol=1e-4, atol=1e-4)

    # 2) bf16 adjacency/activation path (recommended for v6e/v7x): exact 0/1
    #    adjacency, bf16 MXU operands, f32 accumulation -> loose tolerance.
    out_bf16 = jax.block_until_ready(
        gnn_forward(x, edge_index, params, hid_dim=HID,
                    agg_dtype=jnp.bfloat16, tile_m=128, tile_k=128))
    np.testing.assert_allclose(np.asarray(out_bf16), np.asarray(ref),
                               rtol=2e-2, atol=2e-2)

    print("KERNEL_OK")
</pallas_src>

<mosaic_0001>
module attributes {stable_mosaic.version = 11 : i64} {
  func.func @project_kernel(%arg0: i32, %arg1: memref<128x64xf32, #tpu.memory_space<vmem>>, %arg2: memref<64x256xf32, #tpu.memory_space<vmem>>, %arg3: memref<128x256xf32, #tpu.memory_space<vmem>>) attributes {dimension_semantics = [#tpu.dimension_semantics<parallel>], iteration_bounds = array<i64: 2>, scalar_prefetch = 0 : i64, scratch_operands = 0 : i64, tpu.core_type = #tpu.core_type<tc>, window_params = [{transform_indices = @transform_0, window_bounds = array<i64: 128, 64>}, {pipeline_mode = #tpu.pipeline_mode<synchronous>, transform_indices = @transform_1, window_bounds = array<i64: 64, 256>}, {transform_indices = @transform_2, window_bounds = array<i64: 128, 256>}]} {
    %c0 = arith.constant 0 : index
    %c0_0 = arith.constant 0 : index
    %0 = vector.load %arg1[%c0, %c0_0] : memref<128x64xf32, #tpu.memory_space<vmem>>, vector<128x64xf32>
    %c0_1 = arith.constant 0 : index
    %c0_2 = arith.constant 0 : index
    %1 = vector.load %arg2[%c0_1, %c0_2] : memref<64x256xf32, #tpu.memory_space<vmem>>, vector<64x256xf32>
    %cst = arith.constant dense<0.000000e+00> : vector<128x256xf32>
    %2 = tpu.matmul %0, %1, %cst {dimension_numbers = #tpu.dot_dimension_numbers<[1], [0], [0], [1], [0, 0, 1, 1], [], []>} : vector<128x64xf32>, vector<64x256xf32>, vector<128x256xf32> -> vector<128x256xf32>
    %c0_3 = arith.constant 0 : index
    %c0_4 = arith.constant 0 : index
    %3 = vector.load %arg3[%c0_3, %c0_4] : memref<128x256xf32, #tpu.memory_space<vmem>>, vector<128x256xf32>
    tpu.vector_store %arg3[%c0_3, %c0_4], %2 {strides = array<i32>} : memref<128x256xf32, #tpu.memory_space<vmem>>, vector<128x256xf32>,
    return
  }
  func.func @transform_0(%arg0: i32) -> (i32, i32) {
    %c0_i32 = arith.constant 0 : i32
    %c0_i32_0 = arith.constant 0 : i32
    return %arg0, %c0_i32 : i32, i32
  }
  func.func @transform_1(%arg0: i32) -> (i32, i32) {
    %c0_i32 = arith.constant 0 : i32
    %c0_i32_0 = arith.constant 0 : i32
    %c0_i32_1 = arith.constant 0 : i32
    return %c0_i32, %c0_i32_0 : i32, i32
  }
  func.func @transform_2(%arg0: i32) -> (i32, i32) {
    %c0_i32 = arith.constant 0 : i32
    %c0_i32_0 = arith.constant 0 : i32
    return %arg0, %c0_i32 : i32, i32
  }
}

</mosaic_0001>

<bundles_post_ra>
// kernel: tpu_custom_call.1
= control target key start
LH: loop header
LB: loop body
LE: loop exit
PB: predicated region body
PF: predicated region fallthrough
CT: control target
= control target key end

     0   :  { %7 = vsyncpa [#allocation3], 0  ;;  %s873_s0 = inlined_call_operand.vmem [shape: f32[256,64], index: 0, kind: input, shape index: {}]   ;;  %s874_s1 = inlined_call_operand.vmem [shape: f32[64,256], index: 1, kind: input, shape index: {}]   ;;  %s875_s2 = inlined_call_operand.hbm [shape: f32[256,256], index: 2, kind: output, shape index: {}]  }
   0x1   :  { %9 = vsyncpa [#allocation3 + $0x1], 0  ;;  %s652_s9 = smov 0   ;;  %s654_s10 = smov 0  }
   0x2   :  { %s656_s11 = smov 0   ;;  %s658_s12 = smov 0  }
   0x3 LB: > { %s673_s13 = sadd.s32 4294967295, %s633_s12   ;;  %s467_s14 = sadd.s32 4294967294, %s633_s12   ;;  %s633_s12 = sphi %s658_s12, %s881_s12   ;;  %s629_s11 = sphi %s656_s11, %s880_s11   ;;  %s625_s10 = sphi %s654_s10, %s879_s10   ;;  %s621_s9 = sphi %s652_s9, %s878_s9  }
   0x4   : > { %s677_s15 = sadd.s32 1, %s633_s12   ;;  %s69_s16 = sadd.s32 1, %s629_s11 }
   0x5   : > { %s66_s17 = ssub.s32 %s633_s12, %s677_s15  ;;  %p79_p0 = scmp.ne.s32.totalorder %s629_s11, %s625_s10 }
   0x6   : > { %p67_p1 = scmp.eq.s32.totalorder %s66_s17, 0  ;;  %p80_p2 = scmp.eq.s32.totalorder %s673_s13, 1 }
   0x7   : > { %p85_p3 = scmp.ne.s32.totalorder %s625_s10, %s621_s9  ;;  %p86_p4 = scmp.eq.s32.totalorder %s467_s14, 1 }
   0x8   : > { %s688_s18 = scalar_select %p67_p1, %s629_s11, %s69_s16  }
   0x9   : > { %p690_p5 = por %p80_p2, %p79_p0  ;;  %p694_p6 = por %p86_p4, %p85_p3 }
   0xa   : > { %p470_p7 = scmp.ge.s32.totalorder %s633_s12, 1  ;;  %p116_p8 = scmp.lt.s32.totalorder %s633_s12, 3 }
   0xc   : > { %p117_p9 = pnand %p470_p7, %p116_p8 }
   0xd   : > { %s472_s27 = sshll.u32 (!%p117_p9), %s673_s13, 4  ;;  %s135_s17 = sand.u32 (!%p117_p9), 1, %s625_s10  }
   0xe   : > { %120 = sbr.rel (%p117_p9) target bundleno = 228 (0xe4), region = 28  ;;  %p139_p10 = scmp.lt.s32.totalorder (!%p117_p9), %s472_s27, 31 }
   0xf   : > { %s471_s21 = sshll.u32 (!%p117_p9), %s135_s17, 8  ;;  %s591_s5 = scalar_lea.hbm (!%p117_p9), %s875_s2, 512 }
  0x10   : > { %s805_s22 = scalar_lea.vmem (!%p117_p9), [#allocation2], %s471_s21 }
  0x11   : > { %s402_s28 = sshll.u32 (!%p117_p9), %s805_s22, 4  ;;  %s403_s28 = int_to_ptr.vmem [resolvable:$true] %s402_s28 }
  0x13   : > { %v175_v0 = vld [vmem:[%s874_s1 + $0x70] sm:$0xff]  ;;  %v176_v1 = vld [vmem:[%s874_s1 + $0x78] sm:$0xff]  ;;  %v173_v2 = vld [vmem:[%s874_s1 + $0x60] sm:$0xff]  ;;  %s883_s27 = smov (!%p139_p10, %s472_s27), 31  ;;  %vm177_vm0 = vcmask 523264  }
  0x14   : > { %514 = vmatpush.msra.mxu2 %v175_v0  ;;  %522 = vmatpush.msra.mxu3 %v176_v1  ;;  %v174_v3 = vld [vmem:[%s874_s1 + $0x68] sm:$0xff]  ;;  %v171_v4 = vld [vmem:[%s874_s1 + $0x50] sm:$0xff]  ;;  %v172_v5 = vld [vmem:[%s874_s1 + $0x58] sm:$0xff]  ;;  %s473_s23 = sshll.u32 %s883_s27, 3 }
  0x15   : > { %234 = vmatpush.msra.mxu0 %v175_v0  ;;  %299 = vmatpush.msra.mxu1 %v176_v1  ;;  %v169_v6 = vld [vmem:[%s874_s1 + $0x40] sm:$0xff]  ;;  %v170_v7 = vld [vmem:[%s874_s1 + $0x48] sm:$0xff]  ;;  %v167_v8 = vld [vmem:[%s874_s1 + $0x30] sm:$0xff]  ;;  %s746_s6 = scalar_lea.vmem %s873_s0, %s473_s23  ;;  %s513_s23 = sshll.u32 %s673_s13, 8 }
  0x16   : > { %515 = vmatpush.msra.mxu2 %v173_v2  ;;  %523 = vmatpush.msra.mxu3 %v174_v3  ;;  %v168_v9 = vld [vmem:[%s874_s1 + $0x38] sm:$0xff]  ;;  %v165_v10 = vld [vmem:[%s874_s1 + $0x20] sm:$0xff]  ;;  %v166_v11 = vld [vmem:[%s874_s1 + $0x28] sm:$0xff]  ;;  %s401_s26 = scalar_lea.hbm %s875_s2, %s513_s23  ;;  %s389_s13 = scalar_lea.sflag [#allocation3], %s135_s17 }
  0x17   : > { %235 = vmatpush.msra.mxu0 %v173_v2  ;;  %300 = vmatpush.msra.mxu1 %v174_v3  ;;  %v163_v12 = vld [vmem:[%s874_s1 + $0x10] sm:$0xff]  ;;  %v164_v13 = vld [vmem:[%s874_s1 + $0x18] sm:$0xff]  ;;  %v161_v14 = vld [vmem:[%s874_s1] sm:$0xff]  ;;  %s404_s29 = sshll.u32 %s401_s26, 4  ;;  %s405_s29 = int_to_ptr.hbm [resolvable:$true] %s404_s29 }
  0x18   : > { %516 = vmatpush.msra.mxu2 %v171_v4  ;;  %524 = vmatpush.msra.mxu3 %v172_v5  ;;  %v162_v15 = vld [vmem:[%s874_s1 + $0x8] sm:$0xff]  ;;  %v153_v16 = vld [vmem:[%s746_s6 + $0x40] sm:$0xff]  ;;  %v155_v20 = vld [vmem:[%s746_s6 + $0x50] sm:$0xff]  ;;  %s585_s30 = sshra.s32 %s405_s29, 4  ;;  %s586_s30 = int_to_ptr.hbm [resolvable:$true] %s585_s30 }
  0x19   : > { %236 = vmatpush.msra.mxu0 %v171_v4  ;;  %301 = vmatpush.msra.mxu1 %v172_v5  ;;  %v145_v17 = vld [vmem:[%s746_s6] sm:$0xff]  ;;  %v154_v18 = vld [vmem:[%s746_s6 + $0x48] sm:$0xff]  ;;  %v147_v21 = vld [vmem:[%s746_s6 + $0x10] sm:$0xff]  ;;  %s587_s3 = scalar_lea.hbm %s586_s30, 256  ;;  %p592_p0 = scmp.lt.s32.totalorder %s586_s30, %s875_s2 }
  0x1a   : > { %517 = vmatpush.msra.mxu2 %v169_v6  ;;  %525 = vmatpush.msra.mxu3 %v170_v7  ;;  %v146_v19 = vld [vmem:[%s746_s6 + $0x8] sm:$0xff]  ;;  %v156_v22 = vld [vmem:[%s746_s6 + $0x58] sm:$0xff]  ;;  %v157_v24 = vld [vmem:[%s746_s6 + $0x60] sm:$0xff]  ;;  %p588_p11 = scmp.ne.s32.totalorder %s586_s30, %s587_s3  ;;  %p593_p1 = scmp.lt.s32.totalorder %s591_s5, %s587_s3 }
  0x1b   : > { %237 = vmatpush.msra.mxu0 %v169_v6  ;;  %302 = vmatpush.msra.mxu1 %v170_v7  ;;  %v148_v23 = vld [vmem:[%s746_s6 + $0x18] sm:$0xff]  ;;  %v149_v25 = vld [vmem:[%s746_s6 + $0x20] sm:$0xff]  ;;  %v158_v26 = vld [vmem:[%s746_s6 + $0x68] sm:$0xff] }
  0x1c   : > { %518 = vmatpush.msra.mxu2 %v167_v8  ;;  %526 = vmatpush.msra.mxu3 %v168_v9  ;;  %v150_v27 = vld [vmem:[%s746_s6 + $0x28] sm:$0xff]  ;;  %v159_v28 = vld [vmem:[%s746_s6 + $0x70] sm:$0xff]  ;;  %v160_v30 = vld [vmem:[%s746_s6 + $0x78] sm:$0xff]  ;;  %p589_p12 = pnand %p588_p11, %p690_p5  ;;  %p594_p2 = por %p593_p1, %p592_p0 }
  0x1d   : > { %238 = vmatpush.msra.mxu0 %v167_v8  ;;  %303 = vmatpush.msra.mxu1 %v168_v9  ;;  %v151_v29 = vld [vmem:[%s746_s6 + $0x30] sm:$0xff]  ;;  %v152_v31 = vld [vmem:[%s746_s6 + $0x38] sm:$0xff] }
  0x1e   : > { %519 = vmatpush.msra.mxu2 %v165_v10  ;;  %527 = vmatpush.msra.mxu3 %v166_v11  ;;  %p590_p13 = pneg %p589_p12 }
  0x1f   : > { %239 = vmatpush.msra.mxu0 %v165_v10  ;;  %304 = vmatpush.msra.mxu1 %v166_v11 }
  0x20   : > { %520 = vmatpush.msra.mxu2 %v163_v12  ;;  %528 = vmatpush.msra.mxu3 %v164_v13  ;;  %p595_p3 = pnand %p594_p2, %p590_p13 }
  0x21   : > { %240 = vmatpush.msra.mxu0 %v163_v12  ;;  %305 = vmatpush.msra.mxu1 %v164_v13 }
  0x22   : > { %521 = vmatpush.msra.mxu2 %v161_v14  ;;  %529 = vmatpush.msra.mxu3 %v162_v15 }
  0x23   : > { %482 = vmatmul.msk.f32.vlgmr.msra.gmra.mxu2 %vm177_vm0, %v153_v16  ;;  %498 = vmatmul.msk.f32.vlgmr.msra.gmra.mxu3 %vm177_vm0, %v153_v16 }
  0x24   : > { %241 = vmatpush.msra.mxu0 %v161_v14  ;;  %306 = vmatpush.msra.mxu1 %v162_v15 }
  0x25   : > { %474 = vmatmul.msk.f32.vlgmr.msra.gmra.mxu0 %vm177_vm0, %v145_v17  ;;  %490 = vmatmul.msk.f32.vlgmr.msra.gmra.mxu1 %vm177_vm0, %v145_v17 }
  0x2b   : > { %483 = vmatmul.msk.f32.gmra.mxu2 %vm177_vm0, %v154_v18  ;;  %499 = vmatmul.msk.f32.gmra.mxu3 %vm177_vm0, %v154_v18 }
  0x2d   : > { %475 = vmatmul.msk.f32.gmra.mxu0 %vm177_vm0, %v146_v19  ;;  %491 = vmatmul.msk.f32.gmra.mxu1 %vm177_vm0, %v146_v19 }
  0x33   : > { %484 = vmatmul.msk.f32.gmra.mxu2 %vm177_vm0, %v155_v20  ;;  %500 = vmatmul.msk.f32.gmra.mxu3 %vm177_vm0, %v155_v20 }
  0x35   : > { %476 = vmatmul.msk.f32.gmra.mxu0 %vm177_vm0, %v147_v21  ;;  %492 = vmatmul.msk.f32.gmra.mxu1 %vm177_vm0, %v147_v21 }
  0x3b   : > { %485 = vmatmul.msk.f32.gmra.mxu2 %vm177_vm0, %v156_v22  ;;  %501 = vmatmul.msk.f32.gmra.mxu3 %vm177_vm0, %v156_v22 }
  0x3d   : > { %477 = vmatmul.msk.f32.gmra.mxu0 %vm177_vm0, %v148_v23  ;;  %493 = vmatmul.msk.f32.gmra.mxu1 %vm177_vm0, %v148_v23 }
  0x43   : > { %486 = vmatmul.msk.f32.gmra.mxu2 %vm177_vm0, %v157_v24  ;;  %502 = vmatmul.msk.f32.gmra.mxu3 %vm177_vm0, %v157_v24 }
  0x45   : > { %478 = vmatmul.msk.f32.gmra.mxu0 %vm177_vm0, %v149_v25  ;;  %494 = vmatmul.msk.f32.gmra.mxu1 %vm177_vm0, %v149_v25 }
  0x4b   : > { %487 = vmatmul.msk.f32.gmra.mxu2 %vm177_vm0, %v158_v26  ;;  %503 = vmatmul.msk.f32.gmra.mxu3 %vm177_vm0, %v158_v26 }
  0x4d   : > { %479 = vmatmul.msk.f32.gmra.mxu0 %vm177_vm0, %v150_v27  ;;  %495 = vmatmul.msk.f32.gmra.mxu1 %vm177_vm0, %v150_v27 }
  0x53   : > { %488 = vmatmul.msk.f32.gmra.mxu2 %vm177_vm0, %v159_v28  ;;  %504 = vmatmul.msk.f32.gmra.mxu3 %vm177_vm0, %v159_v28 }
  0x55   : > { %480 = vmatmul.msk.f32.gmra.mxu0 %vm177_vm0, %v151_v29  ;;  %496 = vmatmul.msk.f32.gmra.mxu1 %vm177_vm0, %v151_v29 }
  0x5b   : > { %489 = vmatmul.msk.f32.gmra.mxu2 %vm177_vm0, %v160_v30  ;;  %505 = vmatmul.msk.f32.gmra.mxu3 %vm177_vm0, %v160_v30 }
  0x5d   : > { %481 = vmatmul.msk.f32.gmra.mxu0 %vm177_vm0, %v152_v31  ;;  %497 = vmatmul.msk.f32.gmra.mxu1 %vm177_vm0, %v152_v31 }
  0xa2   : > { %v243_v32 = vpop.f32.mrf.mxu0  ;;  %v308_v33 = vpop.f32.mrf.mxu1 }
  0xa3   : > { %356 = vst [vmem:[%s805_s22] sm:$0xff] %v243_v32 }
  0xa4   : > { %357 = vst [vmem:[%s805_s22 + $0x8] sm:$0xff] %v308_v33 }
  0xa6   : > { %v267_v34 = vpop.f32.mrf.mxu2  ;;  %v332_v35 = vpop.f32.mrf.mxu3 }
  0xa7   : > { %372 = vst [vmem:[%s805_s22 + $0x80] sm:$0xff] %v267_v34 }
  0xa8   : > { %373 = vst [vmem:[%s805_s22 + $0x88] sm:$0xff] %v332_v35 }
  0xaa   : > { %v246_v36 = vpop.f32.mrf.mxu0  ;;  %v311_v37 = vpop.f32.mrf.mxu1 }
  0xab   : > { %358 = vst [vmem:[%s805_s22 + $0x10] sm:$0xff] %v246_v36 }
  0xac   : > { %359 = vst [vmem:[%s805_s22 + $0x18] sm:$0xff] %v311_v37 }
  0xae   : > { %v270_v38 = vpop.f32.mrf.mxu2  ;;  %v335_v39 = vpop.f32.mrf.mxu3 }
  0xaf   : > { %374 = vst [vmem:[%s805_s22 + $0x90] sm:$0xff] %v270_v38 }
  0xb0   : > { %375 = vst [vmem:[%s805_s22 + $0x98] sm:$0xff] %v335_v39 }
  0xb2   : > { %v249_v40 = vpop.f32.mrf.mxu0  ;;  %v314_v41 = vpop.f32.mrf.mxu1 }
  0xb3   : > { %360 = vst [vmem:[%s805_s22 + $0x20] sm:$0xff] %v249_v40 }
  0xb4   : > { %361 = vst [vmem:[%s805_s22 + $0x28] sm:$0xff] %v314_v41 }
  0xb6   : > { %v273_v42 = vpop.f32.mrf.mxu2  ;;  %v338_v43 = vpop.f32.mrf.mxu3 }
  0xb7   : > { %376 = vst [vmem:[%s805_s22 + $0xa0] sm:$0xff] %v273_v42 }
  0xb8   : > { %377 = vst [vmem:[%s805_s22 + $0xa8] sm:$0xff] %v338_v43 }
  0xba   : > { %v252_v44 = vpop.f32.mrf.mxu0  ;;  %v317_v45 = vpop.f32.mrf.mxu1 }
  0xbb   : > { %362 = vst [vmem:[%s805_s22 + $0x30] sm:$0xff] %v252_v44 }
  0xbc   : > { %363 = vst [vmem:[%s805_s22 + $0x38] sm:$0xff] %v317_v45 }
  0xbe   : > { %v276_v46 = vpop.f32.mrf.mxu2  ;;  %v341_v47 = vpop.f32.mrf.mxu3 }
  0xbf   : > { %378 = vst [vmem:[%s805_s22 + $0xb0] sm:$0xff] %v276_v46 }
  0xc0   : > { %379 = vst [vmem:[%s805_s22 + $0xb8] sm:$0xff] %v341_v47 }
  0xc2   : > { %v255_v48 = vpop.f32.mrf.mxu0  ;;  %v320_v49 = vpop.f32.mrf.mxu1 }
  0xc3   : > { %364 = vst [vmem:[%s805_s22 + $0x40] sm:$0xff] %v255_v48 }
  0xc4   : > { %365 = vst [vmem:[%s805_s22 + $0x48] sm:$0xff] %v320_v49 }
  0xc6   : > { %v279_v50 = vpop.f32.mrf.mxu2  ;;  %v344_v51 = vpop.f32.mrf.mxu3 }
  0xc7   : > { %380 = vst [vmem:[%s805_s22 + $0xc0] sm:$0xff] %v279_v50 }
  0xc8   : > { %381 = vst [vmem:[%s805_s22 + $0xc8] sm:$0xff] %v344_v51 }
  0xca   : > { %v258_v52 = vpop.f32.mrf.mxu0  ;;  %v323_v53 = vpop.f32.mrf.mxu1 }
  0xcb   : > { %366 = vst [vmem:[%s805_s22 + $0x50] sm:$0xff] %v258_v52 }
  0xcc   : > { %367 = vst [vmem:[%s805_s22 + $0x58] sm:$0xff] %v323_v53 }
  0xce   : > { %v282_v54 = vpop.f32.mrf.mxu2  ;;  %v347_v55 = vpop.f32.mrf.mxu3 }
  0xcf   : > { %382 = vst [vmem:[%s805_s22 + $0xd0] sm:$0xff] %v282_v54 }
  0xd0   : > { %383 = vst [vmem:[%s805_s22 + $0xd8] sm:$0xff] %v347_v55 }
  0xd2   : > { %v261_v56 = vpop.f32.mrf.mxu0  ;;  %v326_v57 = vpop.f32.mrf.mxu1 }
  0xd3   : > { %368 = vst [vmem:[%s805_s22 + $0x60] sm:$0xff] %v261_v56 }
  0xd4   : > { %369 = vst [vmem:[%s805_s22 + $0x68] sm:$0xff] %v326_v57 }
  0xd6   : > { %v285_v58 = vpop.f32.mrf.mxu2  ;;  %v350_v59 = vpop.f32.mrf.mxu3 }
  0xd7   : > { %384 = vst [vmem:[%s805_s22 + $0xe0] sm:$0xff] %v285_v58 }
  0xd8   : > { %385 = vst [vmem:[%s805_s22 + $0xe8] sm:$0xff] %v350_v59 }
  0xda   : > { %v264_v60 = vpop.f32.mrf.mxu0  ;;  %v329_v61 = vpop.f32.mrf.mxu1 }
  0xdb   : > { %370 = vst [vmem:[%s805_s22 + $0x70] sm:$0xff] %v264_v60 }
  0xdc   : > { %371 = vst [vmem:[%s805_s22 + $0x78] sm:$0xff] %v329_v61 }
  0xde   : > { %v288_v62 = vpop.f32.mrf.mxu2  ;;  %v353_v63 = vpop.f32.mrf.mxu3 }
  0xdf   : > { %386 = vst [vmem:[%s805_s22 + $0xf0] sm:$0xff] %v288_v62 }
  0xe0   : > { %387 = vst [vmem:[%s805_s22 + $0xf8] sm:$0xff] %v353_v63 }
  0xe1   : > { %598 = shalt.err (!%p595_p3)
}
  0xe2   : > { %s635_s8 = smov 256   ;;  %s636_s14 = smov 16  }
  0xe3   : > { %530 = dma.vmem_to_hbm [thread:$0]  (%p690_p5), %s403_s28, 4096, %s405_s29, %s389_s13, %s635_s8, %s635_s8, %s636_s14  }
  0xe4 PF: > { %p536_p4 = scmp.ge.s32.totalorder %s633_s12, 2  ;;  %s419_s16 = sand.u32 1, %s621_s9  }
  0xe5   : > { %s420_s17 = scalar_lea.sflag [#allocation3], %s419_s16 }
  0xe6   : > { %p533_p7 = pnand %p536_p4, %p694_p6 }
  0xe8   : > { %p534_p8 = pneg %p533_p7 }
  0xea   : > { %616 = dma.done.wait (%p534_p8), %s420_s17, 4096  }
  0xeb   : > { %618 = vsyncadd (%p534_p8), %s420_s17, 4294963200  ;;  %p12_p9 = scmp.ge.s32.totalorder %s677_s15, 4   ;;  %s878_s9 = smov %s625_s10 }
  0xec   : > { %s879_s10 = smov %s629_s11  ;;  %s880_s11 = smov %s688_s18 }
  0xed   : > { %s881_s12 = smov %s677_s15  ;;  %14 = sbr.rel (!%p12_p9) target bundleno = 3 (0x3), region = 63 }
  0xf2   :  { %426 = vsyncpa [#allocation3], 1 }
  0xf3   :  { %428 = vsyncpa [#allocation3 + $0x1], 1 }

</bundles_post_ra>
